<compile_context>
chip_gen: v6e
topology: v6e:2x2x1
jax: 0.10.0
libtpu: 0.0.40
codegen_flags: <defaults>
</compile_context>

<pallas_src>
import math

import jax
import jax.numpy as jnp
from jax.experimental import pallas as pl
from jax.experimental.pallas import tpu as pltpu

_SMALL_BYTES = 1 << 19  # below this, a fused XLA elementwise op wins


def _bias_add_kernel(x_ref, td_ref, nd_ref, o_ref):
    # x_ref : (1, C, TILE_NT)  lane-dense slab of x for one (batch, NT-tile)
    # td_ref: (1, C, TILE_NT)  pre-tiled time+day bias (same block for all NT tiles)
    # nd_ref: (C, TILE_NT)     node+degree bias slice (same block for all batches)
    # Single fused expression: no in-kernel concat/tile, no extra full-tile temp.
    o_ref[...] = (x_ref[...] + td_ref[...] + nd_ref[...][None, :, :]).astype(o_ref.dtype)


def _pick_tile_nt(NT, T, C, itemsize):
    """Largest divisor of NT that is a multiple of the td replication period
    (lcm(T, 128) when that divides NT, else T), capped at ~2048 lanes and
    ~4 MiB per block so double-buffered tiles fit comfortably in VMEM on all
    generations (incl. v7x's 64 MiB)."""
    period = (T * 128) // math.gcd(T, 128)  # lcm(T, 128)
    if NT % period != 0:
        period = T  # always divides NT = N*T; td tiling stays aligned
    max_lanes = max(period, 2048)
    max_bytes = 4 << 20
    best = period
    k = 2
    while True:
        cand = period * k
        if cand > NT or cand > max_lanes or cand * C * itemsize > max_bytes:
            break
        if NT % cand == 0:
            best = cand
        k += 1
    return best


def embedding_forward(x, idx, node_ids, degrees, tables, *,
                      force_pallas=False, donate_x=False):
    """x: (B,C,N,T); idx: (B,2,T) int; node_ids/degrees: (N,) int or None;
    tables: dict of (V, C) embedding weights (keys: time/day/node/degree,
    values may be None)."""
    B, C, N, T = x.shape
    NT = N * T
    idx = idx.astype(jnp.int32)

    # Keep biases in bf16 only when x itself is bf16 (v6e/v7x VMEM/HBM saving);
    # otherwise stay f32 to match the PyTorch reference numerics.
    bias_dtype = x.dtype if x.dtype == jnp.bfloat16 else jnp.float32

    # --- wrapper-side gathers, fused into two tiny bias slabs ---------------
    td = jnp.zeros((B, T, C), jnp.float32)
    if tables.get("time") is not None:
        td = td + tables["time"].astype(jnp.float32)[idx[:, 0]]
    if tables.get("day") is not None:
        td = td + tables["day"].astype(jnp.float32)[idx[:, 1]]
    td = jnp.transpose(td, (0, 2, 1)).astype(bias_dtype)        # (B, C, T)

    nd = jnp.zeros((N, C), jnp.float32)
    if tables.get("node") is not None and node_ids is not None:
        nd = nd + tables["node"].astype(jnp.float32)[node_ids.astype(jnp.int32)]
    if tables.get("degree") is not None and degrees is not None:
        nd = nd + tables["degree"].astype(jnp.float32)[degrees.astype(jnp.int32)]
    nd_t = nd.T.astype(bias_dtype)                              # (C, N)

    # --- small-problem fallback: fused XLA elementwise beats launch overhead
    x_item = x.dtype.itemsize
    if (x.size * x_item < _SMALL_BYTES) and not force_pallas:
        out = x + td[:, :, None, :] + nd_t[None, :, :, None]
        return out.astype(x.dtype)

    # --- Pallas path ---------------------------------------------------------
    b_item = jnp.dtype(bias_dtype).itemsize
    TILE_NT = _pick_tile_nt(NT, T, C, x_item)

    # Pre-tile the per-batch time/day bias to one NT-tile period: lane
    # k = n*T + t within any TILE_NT-aligned window maps to td[:, k % T],
    # identical for every window, so its NT index_map is constant.
    td_tiled = jnp.tile(td, (1, 1, TILE_NT // T))               # (B, C, TILE_NT)
    # Node/degree bias repeated T-fold along lanes: lane n*T + t -> nd_t[:, n].
    nd_full = jnp.repeat(nd_t, T, axis=-1)                      # (C, NT)

    # Free view: lane-dense last dim.
    x2 = x.reshape(B, C, NT)

    grid = (B, NT // TILE_NT)

    # VMEM: double-buffered x/out/td/nd blocks + slack; explicit limit so the
    # default scoped limit (16 MiB v5e / 32 MiB v6e,v7x) never rejects tiles.
    vmem_est = 2 * C * TILE_NT * (2 * x_item + 2 * b_item)
    vmem_limit = int(min(48 << 20, max(2 * vmem_est + (4 << 20), 32 << 20)))

    cost = pl.CostEstimate(
        flops=int(2 * B * C * NT),
        transcendentals=0,
        bytes_accessed=int(2 * B * C * NT * x_item
                           + B * C * TILE_NT * b_item
                           + C * NT * b_item),
    )

    out2 = pl.pallas_call(
        _bias_add_kernel,
        out_shape=jax.ShapeDtypeStruct((B, C, NT), x.dtype),
        grid_spec=pltpu.PrefetchScalarGridSpec(
            num_scalar_prefetch=0,
            grid=grid,
            in_specs=[
                pl.BlockSpec((1, C, TILE_NT), lambda b, j: (b, 0, j)),  # x slab
                pl.BlockSpec((1, C, TILE_NT), lambda b, j: (b, 0, 0)),  # time+day (NT-invariant)
                pl.BlockSpec((C, TILE_NT), lambda b, j: (0, j)),        # node+deg (batch-invariant)
            ],
            out_specs=pl.BlockSpec((1, C, TILE_NT), lambda b, j: (b, 0, j)),
        ),
        compiler_params=pltpu.CompilerParams(
            dimension_semantics=("parallel", "parallel"),
            vmem_limit_bytes=vmem_limit),
        cost_estimate=cost,
        # Output reuses x's HBM buffer when the caller donates x at the jit
        # boundary; off by default so a non-donated call does not force a copy.
        input_output_aliases={0: 0} if donate_x else {},
    )(x2, td_tiled, nd_full)

    return out2.reshape(B, C, N, T)


def _reference_forward(x, idx, node_ids, degrees, tables):
    t = tables["time"][idx[:, 0]]                      # (B, T, C)
    d = tables["day"][idx[:, 1]]                       # (B, T, C)
    n = tables["node"][node_ids]                       # (N, C)
    g = tables["degree"][degrees]                      # (N, C)
    out = x + jnp.transpose(t, (0, 2, 1))[:, :, None, :]
    out = out + jnp.transpose(d, (0, 2, 1))[:, :, None, :]
    out = out + jnp.transpose(n)[None, :, :, None]
    out = out + jnp.transpose(g)[None, :, :, None]
    return out


if __name__ == "__main__":
    # module config: embedding_dim == C; all four embeddings present.
    B, C, N, T = 2, 8, 16, 16
    emb_cfg = {"time": 48, "day": 7, "node": 16, "degree": 5}

    key = jax.random.PRNGKey(0)
    kx, kt, kd, kn, kg, ki, kj, kni, kdg = jax.random.split(key, 9)

    x = jax.random.normal(kx, (B, C, N, T), dtype=jnp.float32)
    # nn.Embedding default init ~ N(0, 1); vocab size is (depth + 1).
    tables = {
        "time":   jax.random.normal(kt, (emb_cfg["time"] + 1, C), jnp.float32),
        "day":    jax.random.normal(kd, (emb_cfg["day"] + 1, C), jnp.float32),
        "node":   jax.random.normal(kn, (emb_cfg["node"] + 1, C), jnp.float32),
        "degree": jax.random.normal(kg, (emb_cfg["degree"] + 1, C), jnp.float32),
    }
    idx_time = jax.random.randint(ki, (B, 1, T), 0, emb_cfg["time"] + 1)
    idx_day = jax.random.randint(kj, (B, 1, T), 0, emb_cfg["day"] + 1)
    idx = jnp.concatenate([idx_time, idx_day], axis=1).astype(jnp.int32)  # (B,2,T)
    node_ids = jax.random.randint(kni, (N,), 0, emb_cfg["node"] + 1).astype(jnp.int32)
    degrees = jax.random.randint(kdg, (N,), 0, emb_cfg["degree"] + 1).astype(jnp.int32)

    ref = _reference_forward(x, idx, node_ids, degrees, tables)

    # Exercise the Pallas kernel explicitly (test shapes are below the
    # small-problem threshold where the auto path would use the jnp fallback).
    out = embedding_forward(x, idx, node_ids, degrees, tables, force_pallas=True)
    out = jax.block_until_ready(out)
    assert out.shape == (B, C, N, T)
    assert jnp.allclose(out, ref, atol=1e-5, rtol=1e-5), "pallas mismatch vs reference"

    # Auto-dispatch path (small-problem fallback) must agree as well.
    out_auto = embedding_forward(x, idx, node_ids, degrees, tables)
    out_auto = jax.block_until_ready(out_auto)
    assert jnp.allclose(out_auto, ref, atol=1e-5, rtol=1e-5), "fallback mismatch vs reference"

    print("KERNEL_OK")
</pallas_src>

<mosaic_0001>
module attributes {stable_mosaic.version = 11 : i64} {
  func.func @_bias_add_kernel(%arg0: i32, %arg1: i32, %arg2: memref<1x8x256xf32, #tpu.memory_space<vmem>>, %arg3: memref<1x8x256xf32, #tpu.memory_space<vmem>>, %arg4: memref<8x256xf32, #tpu.memory_space<vmem>>, %arg5: memref<1x8x256xf32, #tpu.memory_space<vmem>>) attributes {dimension_semantics = [#tpu.dimension_semantics<parallel>, #tpu.dimension_semantics<parallel>], iteration_bounds = array<i64: 2, 1>, scalar_prefetch = 0 : i64, scratch_operands = 0 : i64, tpu.core_type = #tpu.core_type<tc>, window_params = [{transform_indices = @transform_0, window_bounds = array<i64: 1, 8, 256>}, {transform_indices = @transform_1, window_bounds = array<i64: 1, 8, 256>}, {transform_indices = @transform_2, window_bounds = array<i64: 8, 256>}, {transform_indices = @transform_3, window_bounds = array<i64: 1, 8, 256>}]} {
    %c0 = arith.constant 0 : index
    %c0_0 = arith.constant 0 : index
    %c0_1 = arith.constant 0 : index
    %0 = vector.load %arg2[%c0, %c0_0, %c0_1] : memref<1x8x256xf32, #tpu.memory_space<vmem>>, vector<1x8x256xf32>
    %c0_2 = arith.constant 0 : index
    %c0_3 = arith.constant 0 : index
    %c0_4 = arith.constant 0 : index
    %1 = vector.load %arg3[%c0_2, %c0_3, %c0_4] : memref<1x8x256xf32, #tpu.memory_space<vmem>>, vector<1x8x256xf32>
    %2 = arith.addf %0, %1 : vector<1x8x256xf32>
    %c0_5 = arith.constant 0 : index
    %c0_6 = arith.constant 0 : index
    %3 = vector.load %arg4[%c0_5, %c0_6] : memref<8x256xf32, #tpu.memory_space<vmem>>, vector<8x256xf32>
    %4 = vector.shape_cast %3 : vector<8x256xf32> to vector<1x8x256xf32>
    %5 = arith.addf %2, %4 : vector<1x8x256xf32>
    %c0_7 = arith.constant 0 : index
    %c0_8 = arith.constant 0 : index
    %c0_9 = arith.constant 0 : index
    %6 = vector.load %arg5[%c0_7, %c0_8, %c0_9] : memref<1x8x256xf32, #tpu.memory_space<vmem>>, vector<1x8x256xf32>
    tpu.vector_store %arg5[%c0_7, %c0_8, %c0_9], %5 {strides = array<i32>} : memref<1x8x256xf32, #tpu.memory_space<vmem>>, vector<1x8x256xf32>,
    return
  }
  func.func @transform_0(%arg0: i32, %arg1: i32) -> (i32, i32, i32) {
    %c0_i32 = arith.constant 0 : i32
    %c0_i32_0 = arith.constant 0 : i32
    return %arg0, %c0_i32, %arg1 : i32, i32, i32
  }
  func.func @transform_1(%arg0: i32, %arg1: i32) -> (i32, i32, i32) {
    %c0_i32 = arith.constant 0 : i32
    %c0_i32_0 = arith.constant 0 : i32
    %c0_i32_1 = arith.constant 0 : i32
    return %arg0, %c0_i32, %c0_i32_0 : i32, i32, i32
  }
  func.func @transform_2(%arg0: i32, %arg1: i32) -> (i32, i32) {
    %c0_i32 = arith.constant 0 : i32
    %c0_i32_0 = arith.constant 0 : i32
    return %c0_i32, %arg1 : i32, i32
  }
  func.func @transform_3(%arg0: i32, %arg1: i32) -> (i32, i32, i32) {
    %c0_i32 = arith.constant 0 : i32
    %c0_i32_0 = arith.constant 0 : i32
    return %arg0, %c0_i32, %arg1 : i32, i32, i32
  }
}

</mosaic_0001>

<bundles_post_ra>
// kernel: tpu_custom_call.1
= control target key start
LH: loop header
LB: loop body
LE: loop exit
PB: predicated region body
PF: predicated region fallthrough
CT: control target
= control target key end

     0   :  { %s894_s0 = inlined_call_operand.hbm [shape: f32[2,8,256], index: 0, kind: input, shape index: {}]   ;;  %s895_s1 = inlined_call_operand.hbm [shape: f32[2,8,256], index: 1, kind: input, shape index: {}]   ;;  %s896_s2 = inlined_call_operand.hbm [shape: f32[8,256], index: 2, kind: input, shape index: {}]   ;;  %s897_s3 = inlined_call_operand.hbm [shape: f32[2,8,256], index: 3, kind: output, shape index: {}]  }
   0x1   :  { %898 = sst [smem:[#allocation13_spill]] %s894_s0 }
   0x2   :  { %8 = vsyncpa [#allocation3], 0 }
   0x3   :  { %10 = vsyncpa [#allocation3 + $0x1], 0 }
   0x4   :  { %11 = vsyncpa [#allocation6], 0 }
   0x5   :  { %13 = vsyncpa [#allocation6 + $0x1], 0 }
   0x6   :  { %14 = vsyncpa [#allocation4], 0 }
   0x7   :  { %16 = vsyncpa [#allocation4 + $0x1], 0  ;;  %s711_s12 = smov 0   ;;  %s713_s13 = smov 0  }
   0x8   :  { %s715_s14 = smov 0   ;;  %s717_s15 = smov 0  }
   0x9   :  { %s719_s16 = smov 0   ;;  %s721_s17 = smov 0  }
   0xa LB: > { %s742_s18 = sadd.s32 4294967295, %s685_s17   ;;  %s414_s19 = sadd.s32 4294967294, %s685_s17   ;;  %s685_s17 = sphi %s721_s17, %s22_s17   ;;  %s681_s16 = sphi %s719_s16, %s913_s16   ;;  %s677_s15 = sphi %s717_s15, %s912_s15   ;;  %s673_s14 = sphi %s715_s14, %s911_s14   ;;  %s669_s13 = sphi %s713_s13, %s910_s13   ;;  %s665_s12 = sphi %s711_s12, %s909_s12  }
   0xb   : > { %p56_p0 = scmp.ne.s32.totalorder %s669_s13, %s665_s12  ;;  %p57_p1 = scmp.eq.s32.totalorder %s742_s18, 0 }
   0xc   : > { %p140_p3 = scmp.eq.s32.totalorder %s414_s19, 1  ;;  %p415_p5 = scmp.ge.s32.totalorder %s685_s17, 1 }
   0xd   : > { %p751_p4 = por %p57_p1, %p56_p0  ;;  %p147_p7 = scmp.lt.s32.totalorder %s685_s17, 3 }
   0xe   : > { %p756_p6 = por %p140_p3, %p56_p0  ;;  %s687_s23 = smov [#allocation7]  }
   0xf   : > { %p761_p8 = pnand %p415_p5, %p147_p7  ;;  %s163_s24 = sshll.u32 %s687_s23, 4  ;;  %s164_s24 = int_to_ptr.vmem [resolvable:$true] %s163_s24 }
  0x10   : > { %s900_s21 = scalar_select %p756_p6, 1, 0 }
  0x11   : > { %p447_p10 = pneg %p761_p8  ;;  %s34_s26 = sadd.s32 1, %s681_s16 }
  0x12   : > { %s43_s27 = sadd.s32 1, %s673_s14  ;;  %p36_p12 = scmp.ge.s32.totalorder %s34_s26, 2 }
  0x13   : > { %p770_p11 = pnand %p447_p10, %p57_p1  ;;  %s526_s28 = scalar_lea.vmem %s164_s24, 256 }
  0x14   : > { %p527_p0 = scmp.ne.s32.totalorder %s164_s24, %s526_s28  ;;  %p534_p7 = scmp.lt.s32.totalorder %s164_s24, %s164_s24 }
  0x15   : > { %p517_p13 = pneg %p770_p11  ;;  %p535_p2 = scmp.lt.s32.totalorder %s526_s28, %s526_s28 }
  0x17   : > { %p529_p3 = pnand %p527_p0, %p517_p13  ;;  %p536_p9 = por %p535_p2, %p534_p7 }
  0x19   : > { %p530_p5 = pneg %p529_p3 }
  0x1b   : > { %p537_p6 = pnand %p536_p9, %p530_p5 }
  0x1d   : > { %540 = shalt.err (!%p537_p6)
}
  0x1e   : > { %450 = dma.hbm_to_vmem [thread:$0]  (!%p770_p11), %s896_s2, 256, %s164_s24, [#allocation6]  }
  0x1f   : > { %s915_s26 = smov (%p36_p12, %s34_s26), 0  ;;  %p50_p2 = scmp.ne.s32.totalorder %s673_s14, %s669_s13 }
  0x20   : > { %p51_p6 = scmp.eq.s32.totalorder %s685_s17, 0  ;;  %s38_s4 = ssub.s32 %s681_s16, %s915_s26 }
  0x21   : > { %p463_p9 = scmp.lt.s32.totalorder %s685_s17, 2  ;;  %p41_p10 = scmp.eq.s32.totalorder %s38_s4, 0 }
  0x22   : > { %p52_p13 = por %p51_p6, %p50_p2  ;;  %p903_p0 = scmp.eq.s32.totalorder %s742_s18, 1 }
  0x23   : > { %s174_s6 = sand.u32 1, %s673_s14   ;;  %s434_s9 = sshll.u32 %s681_s16, 8 }
  0x24   : > { %p793_p3 = por %p903_p0, %p50_p2  ;;  %s418_s8 = sshll.u32 %s174_s6, 4 }
  0x25   : > { %s799_s7 = scalar_select %p41_p10, %s673_s14, %s43_s27  }
  0x26   : > { %s905_s0 = sld [smem:[#allocation13_spill]]  ;;  %s178_s23 = scalar_lea.vmem [#allocation2], %s418_s8 }
  0x27   : > { %s188_s24 = sshll.u32 %s178_s23, 4  ;;  %p805_p11 = pnand %p463_p9, %p52_p13  ;;  %s189_s24 = int_to_ptr.vmem [resolvable:$true] %s188_s24 }
  0x28   : > { %s812_s27 = scalar_lea.hbm %s895_s1, %s434_s9  ;;  %s195_s30 = sand.u32 1, %s685_s17  }
  0x29   : > { %s175_s4 = scalar_lea.sflag [#allocation3], %s174_s6  ;;  %p543_p12 = pneg %p805_p11 }
  0x2a   : > { %s554_s10 = scalar_lea.vmem %s189_s24, 256  ;;  %s688_s11 = smov [#allocation2]  }
  0x2b   : > { %p555_p5 = scmp.ne.s32.totalorder %s189_s24, %s554_s10  ;;  %s559_s23 = sshll.u32 %s688_s11, 4  ;;  %s560_s23 = int_to_ptr.vmem [resolvable:$false] %s559_s23 }
  0x2c   : > { %s186_s19 = scalar_lea.hbm %s905_s0, %s434_s9  ;;  %s561_s0 = scalar_lea.vmem %s560_s23, 512 }
  0x2d   : > { %p557_p7 = pnand %p555_p5, %p543_p12  ;;  %p562_p6 = scmp.lt.s32.totalorder %s189_s24, %s560_s23 }
  0x2e   : > { %p563_p9 = scmp.lt.s32.totalorder %s561_s0, %s554_s10 }
  0x2f   : > { %p558_p2 = pneg %p557_p7 }
  0x30   : > { %p564_p10 = por %p563_p9, %p562_p6 }
  0x32   : > { %p565_p13 = pnand %p564_p10, %p558_p2 }
  0x34   : > { %568 = shalt.err (!%p565_p13)
}
  0x35   : > { %454 = dma.hbm_to_vmem [thread:$0]  (!%p805_p11), %s186_s19, 256, %s189_s24, %s175_s4  }
  0x36   : > { %s199_s6 = scalar_lea.vmem [#allocation5], %s418_s8  ;;  %s196_s28 = scalar_lea.sflag [#allocation6], %s195_s30 }
  0x37   : > { %s207_s9 = sshll.u32 %s199_s6, 4  ;;  %s689_s11 = smov [#allocation5]   ;;  %s208_s9 = int_to_ptr.vmem [resolvable:$true] %s207_s9 }
  0x38   : > { %s582_s29 = scalar_lea.vmem %s208_s9, 256  ;;  %s587_s23 = sshll.u32 %s689_s11, 4  ;;  %s588_s23 = int_to_ptr.vmem [resolvable:$false] %s587_s23 }
  0x39   : > { %p583_p0 = scmp.ne.s32.totalorder %s208_s9, %s582_s29  ;;  %s589_s0 = scalar_lea.vmem %s588_s23, 512 }
  0x3a   : > { %p590_p2 = scmp.lt.s32.totalorder %s208_s9, %s588_s23  ;;  %p591_p6 = scmp.lt.s32.totalorder %s589_s0, %s582_s29 }
  0x3b   : > { %p585_p5 = pnand %p583_p0, %p543_p12 }
  0x3c   : > { %p592_p9 = por %p591_p6, %p590_p2 }
  0x3d   : > { %p586_p7 = pneg %p585_p5 }
  0x3f   : > { %p593_p10 = pnand %p592_p9, %p586_p7 }
  0x41   : > { %596 = shalt.err (!%p593_p10)
}
  0x42   : > { %457 = dma.hbm_to_vmem [thread:$0]  (!%p805_p11), %s812_s27, 256, %s208_s9, %s196_s28  }
  0x43   : > { %216 = sbr.rel (%p761_p8) target bundleno = 102 (0x66), region = 32  ;;  %s831_s8 = sand.u32 (!%p761_p8), 1, %s669_s13  }
  0x44   : > { %s425_s19 = sshll.u32 (!%p761_p8), %s831_s8, 4  ;;  %s219_s24 = scalar_lea.sflag (!%p761_p8), [#allocation3], %s831_s8 }
  0x45   : > { %s222_s30 = scalar_lea.vmem (!%p761_p8), [#allocation2], %s425_s19 }
  0x48   : > { %648 = dma.done.wait (%p751_p4), %s219_s24, 256  }
  0x49   : > { %650 = vsyncadd (%p751_p4), %s219_s24, 4294967040  ;;  %s227_s25 = sand.u32 1, %s742_s18   ;;  %s231_s22 = scalar_lea.vmem [#allocation5], %s425_s19 }
  0x4a   : > { %s228_s27 = scalar_lea.sflag [#allocation6], %s227_s25 }
  0x4b   : > { %652 = dma.done.wait (%p751_p4), %s228_s27, 256  }
  0x4c   : > { %654 = vsyncadd (%p751_p4), %s228_s27, 4294967040 }
  0x4d   : > { %656 = dma.done.wait (%p57_p1), [#allocation6], 256  }
  0x4e   : > { %658 = vsyncadd (%p57_p1), [#allocation6], 4294967040  ;;  %v266_v0 = vld [vmem:[%s222_s30] sm:$0xff]  ;;  %s262_s4 = scalar_lea.vmem [#allocation8], %s425_s19  ;;  %v267_v4 = vld [vmem:[%s222_s30 + $0x8] sm:$0xff]  ;;  %s436_s20 = sshll.u32 %s677_s15, 8 }
  0x4f   : > { %v268_v1 = vld [vmem:[%s231_s22] sm:$0xff]  ;;  %s295_s10 = sshll.u32 %s262_s4, 4  ;;  %v269_v5 = vld [vmem:[%s231_s22 + $0x8] sm:$0xff]  ;;  %s293_s9 = scalar_lea.hbm %s897_s3, %s436_s20  ;;  %s849_s10 = int_to_ptr.vmem [resolvable:$true] %s295_s10 }
  0x50   : > { %v272_v2 = vld [vmem:[#allocation7] sm:$0xff]  ;;  %v270_v3 = vadd.f32 %v268_v1, %v266_v0  ;;  %v273_v6 = vld [vmem:[#allocation7 + $0x8] sm:$0xff]  ;;  %v271_v7 = vadd.f32 %v269_v5, %v267_v4  ;;  %s279_s28 = scalar_lea.sflag [#allocation4], %s831_s8  ;;  %s597_s29 = scalar_lea.vmem %s849_s10, 256 }
  0x51   : > { %p598_p1 = scmp.ne.s32.totalorder %s849_s10, %s597_s29  ;;  %s690_s15 = smov [#allocation8]  }
  0x52   : > { %v274_v8 = vadd.f32 %v272_v2, %v270_v3  ;;  %v275_v9 = vadd.f32 %v273_v6, %v271_v7  ;;  %s601_s11 = sshll.u32 %s690_s15, 4  ;;  %s602_s11 = int_to_ptr.vmem [resolvable:$false] %s601_s11 }
  0x53   : > { %p599_p4 = pnand %p598_p1, %p793_p3  ;;  %s603_s23 = scalar_lea.vmem %s602_s11, 512 }
  0x54   : > { %276 = vst [vmem:[%s262_s4] sm:$0xff] %v274_v8  ;;  %277 = vst [vmem:[%s262_s4 + $0x8] sm:$0xff] %v275_v9  ;;  %p604_p11 = scmp.lt.s32.totalorder %s849_s10, %s602_s11  ;;  %p605_p12 = scmp.lt.s32.totalorder %s603_s23, %s597_s29 }
  0x55   : > { %p600_p8 = pneg %p599_p4 }
  0x56   : > { %p606_p13 = por %p605_p12, %p604_p11 }
  0x58   : > { %p607_p0 = pnand %p606_p13, %p600_p8 }
  0x5a   : > { %610 = shalt.err (!%p607_p0)
}
  0x5b   : > { %s611_s0 = scalar_lea.hbm %s293_s9, 256  ;;  %s615_s24 = scalar_lea.hbm %s897_s3, 512 }
  0x5c   : > { %p612_p5 = scmp.ne.s32.totalorder %s293_s9, %s611_s0  ;;  %p616_p6 = scmp.lt.s32.totalorder %s293_s9, %s897_s3 }
  0x5d   : > { %p617_p9 = scmp.lt.s32.totalorder %s615_s24, %s611_s0 }
  0x5e   : > { %p613_p7 = pnand %p612_p5, %p793_p3 }
  0x5f   : > { %p618_p10 = por %p617_p9, %p616_p6 }
  0x60   : > { %p614_p2 = pneg %p613_p7 }
  0x62   : > { %p619_p1 = pnand %p618_p10, %p614_p2 }
  0x64   : > { %622 = shalt.err (!%p619_p1)
}
  0x65   : > { %445 = dma.vmem_to_hbm [thread:$0]  (%p793_p3), %s849_s10, 256, %s293_s9, %s279_s28  }
  0x66 PF: > { %s307_s27 = sand.u32 1, %s665_s12   ;;  %p907_p4 = scmp.ne.s32.totalorder %s900_s21, 0 }
  0x67   : > { %p908_p8 = scmp.ge.s32.totalorder %s685_s17, 2  ;;  %s308_s22 = scalar_lea.sflag [#allocation4], %s307_s27 }
  0x69   : > { %p459_p11 = pnand %p908_p8, %p907_p4 }
  0x6b   : > { %p460_p12 = pneg %p459_p11 }
  0x6d   : > { %660 = dma.done.wait (%p460_p12), %s308_s22, 256  }
  0x6e   : > { %662 = vsyncadd (%p460_p12), %s308_s22, 4294967040  ;;  %s22_s17 = sadd.s32 1, %s685_s17   ;;  %s909_s12 = smov %s669_s13 }
  0x6f   : > { %p19_p13 = scmp.ge.s32.totalorder %s22_s17, 4   ;;  %s910_s13 = smov %s673_s14 }
  0x70   : > { %s911_s14 = smov %s799_s7  ;;  %s912_s15 = smov %s681_s16 }
  0x71   : > { %s913_s16 = smov %s915_s26  ;;  %21 = sbr.rel (!%p19_p13) target bundleno = 10 (0xa), region = 95 }
  0x76   :  { %313 = vsyncpa [#allocation3], 1 }
  0x77   :  { %315 = vsyncpa [#allocation3 + $0x1], 1 }
  0x78   :  { %316 = vsyncpa [#allocation6], 1 }
  0x79   :  { %318 = vsyncpa [#allocation6 + $0x1], 1 }
  0x7a   :  { %319 = vsyncpa [#allocation4], 1 }
  0x7b   :  { %321 = vsyncpa [#allocation4 + $0x1], 1 }

</bundles_post_ra>
